<compile_context>
chip_gen: v6e
topology: v6e:2x2x1
jax: 0.10.0
libtpu: 0.0.40
codegen_flags: <defaults>
</compile_context>

<pallas_src>
import functools

import jax
import jax.numpy as jnp
from jax import lax
from jax.experimental import pallas as pl
from jax.experimental.pallas import tpu as pltpu


def _round_up(a, b):
    return (a + b - 1) // b * b


def _layer_norm(v, gamma, beta, eps=1e-5):
    mean = jnp.mean(v, axis=-1, keepdims=True)
    var = jnp.mean(jnp.square(v - mean), axis=-1, keepdims=True)
    return (v - mean) * lax.rsqrt(var + eps) * gamma + beta


# ---------------------------------------------------------------------------
# Kernel 1: one (batch, head) attention head per grid step.
# ---------------------------------------------------------------------------
def _attn_head_kernel(x_ref, msk_ref, wq_ref, wk_ref, wv_ref,
                      bq_ref, bk_ref, bv_ref, o_ref, *, scale):
    xb = x_ref[0]                                             # (T, d_model) bf16
    # QKV projection for this head: bf16 MXU matmuls, f32 accumulation.
    q = jnp.dot(xb, wq_ref[0], preferred_element_type=jnp.float32) + bq_ref[0]
    k = jnp.dot(xb, wk_ref[0], preferred_element_type=jnp.float32) + bk_ref[0]
    v = jnp.dot(xb, wv_ref[0], preferred_element_type=jnp.float32) + bv_ref[0]

    # scores = scale * q @ k^T  (contract d_head of both operands).
    s = lax.dot_general(q.astype(jnp.bfloat16), k.astype(jnp.bfloat16),
                        dimension_numbers=(((1,), (1,)), ((), ())),
                        preferred_element_type=jnp.float32) * scale

    keym = msk_ref[0, 0]                                      # (1, T): 1 = keep key
    s = jnp.where(keym > 0.0, s, -jnp.inf)                    # masked_fill_(-inf)

    # softmax over keys in f32 (attention dropout is identity at inference).
    s = s - jnp.max(s, axis=-1, keepdims=True)
    p = jnp.exp(s)
    p = p * pl.reciprocal(jnp.sum(p, axis=-1, keepdims=True), approx=True)

    av = jnp.dot(p.astype(jnp.bfloat16), v.astype(jnp.bfloat16),
                 preferred_element_type=jnp.float32)          # (T, d_head)
    o_ref[0, 0] = av.astype(o_ref.dtype)


def _attn_call(B, H, T_pad, dm, dh, out_dtype):
    kernel = functools.partial(_attn_head_kernel, scale=1.0 / (dh ** 0.5))
    flops = 2 * B * H * T_pad * dm * 3 * dh + 4 * B * H * T_pad * T_pad * dh
    byts = (B * T_pad * dm * 2 + B * H * T_pad * 4 + 3 * H * dm * dh * 2
            + 3 * H * dh * 4 + B * H * T_pad * dh * 2)
    return pl.pallas_call(
        kernel,
        out_shape=jax.ShapeDtypeStruct((B, H, T_pad, dh), out_dtype),
        grid_spec=pltpu.PrefetchScalarGridSpec(
            num_scalar_prefetch=0,
            grid=(B, H),
            in_specs=[
                pl.BlockSpec((1, T_pad, dm), lambda b, h: (b, 0, 0)),       # x (bf16)
                pl.BlockSpec((1, 1, 1, T_pad), lambda b, h: (b, h, 0, 0)),  # key mask
                pl.BlockSpec((1, dm, dh), lambda b, h: (h, 0, 0)),          # wq
                pl.BlockSpec((1, dm, dh), lambda b, h: (h, 0, 0)),          # wk
                pl.BlockSpec((1, dm, dh), lambda b, h: (h, 0, 0)),          # wv
                pl.BlockSpec((1, 1, dh), lambda b, h: (h, 0, 0)),           # bq
                pl.BlockSpec((1, 1, dh), lambda b, h: (h, 0, 0)),           # bk
                pl.BlockSpec((1, 1, dh), lambda b, h: (h, 0, 0)),           # bv
            ],
            out_specs=pl.BlockSpec((1, 1, T_pad, dh), lambda b, h: (b, h, 0, 0)),
        ),
        compiler_params=pltpu.CompilerParams(
            dimension_semantics=("parallel", "parallel"),
            vmem_limit_bytes=48 * 1024 * 1024),
        cost_estimate=pl.CostEstimate(
            flops=int(flops),
            transcendentals=int(B * H * T_pad * T_pad),
            bytes_accessed=int(byts)),
    )


# ---------------------------------------------------------------------------
# Kernel 2: fused o_net + residual + LayerNorm + mask + Conv-FF + LayerNorm.
# Operates on one (batch, T-tile) halo block per grid step.
# ---------------------------------------------------------------------------
def _ffn_kernel(asm_ref, x_ref, m_ref, wo_ref, w1_ref, b1_ref, w2_ref, b2_ref,
                g1_ref, be1_ref, g2_ref, be2_ref, o_ref,
                *, ksize, t_tile, seq_len):
    p = ksize // 2
    tT = t_tile
    nh = tT + 2 * p                       # conv1 output rows needed by conv2
    t0 = pl.program_id(1) * tT            # first output row of this tile

    asm = asm_ref[0, 0]                                   # (tT+4p, H*dh) bf16
    xh = x_ref[0, 0]                                      # (tT+4p, d_model) f32
    mh = m_ref[0, 0]                                      # (tT+4p, 1) f32

    # o_net (bias-free) + residual + post-LayerNorm + `output *= mask`.
    attn_out = jnp.dot(asm, wo_ref[...], preferred_element_type=jnp.float32)
    ff_in = _layer_norm(xh + attn_out, g1_ref[...], be1_ref[...]) * mh

    # Conv1d(d_model -> d_inner, 'same') + ReLU over the halo rows.
    ffb = ff_in.astype(jnp.bfloat16)
    acc1 = jnp.dot(ffb[0:nh], w1_ref[0], preferred_element_type=jnp.float32)
    for k in range(1, ksize):                             # static tap unroll
        acc1 = acc1 + jnp.dot(ffb[k:k + nh], w1_ref[k],
                              preferred_element_type=jnp.float32)
    h = jnp.maximum(acc1 + b1_ref[...], 0.0)              # (tT+2p, d_inner) f32
    # conv2's 'same' zero padding: h rows outside the real sequence are zero.
    grow = t0 - p + lax.broadcasted_iota(jnp.int32, (nh, 1), 0)
    h = jnp.where((grow >= 0) & (grow < seq_len), h, 0.0)

    # Conv1d(d_inner -> d_model, 'same').
    hb = h.astype(jnp.bfloat16)
    acc2 = jnp.dot(hb[0:tT], w2_ref[0], preferred_element_type=jnp.float32)
    for k in range(1, ksize):
        acc2 = acc2 + jnp.dot(hb[k:k + tT], w2_ref[k],
                              preferred_element_type=jnp.float32)
    core = acc2 + b2_ref[...]                             # (tT, d_model) f32
    # nn.Dropout is identity at inference.

    ff_res = ff_in[2 * p:2 * p + tT]                      # residual = pos_ff input
    out = _layer_norm(ff_res + core, g2_ref[...], be2_ref[...])
    out = out * mh[2 * p:2 * p + tT]                      # final `output *= mask`
    o_ref[0] = out.astype(o_ref.dtype)


def _ffn_call(single_buffer, *, B, nT, tT, tTh, dm, di, Hdh, K, T_pad,
              seq_len, out_dtype):
    # Single-buffer the grid-invariant operands (their block index never
    # changes), halving their VMEM footprint (critical on v7x's 64 MiB VMEM).
    const = dict(pipeline_mode=pl.Buffered(1)) if single_buffer else {}
    kernel = functools.partial(_ffn_kernel, ksize=K, t_tile=tT, seq_len=seq_len)
    nh = tT + 2 * (K // 2)
    flops = (2 * B * T_pad * Hdh * dm
             + 2 * B * nT * K * (nh * dm * di + tT * di * dm))
    byts = (B * nT * tTh * Hdh * 2 + B * nT * tTh * dm * 4 + B * nT * tTh * 4
            + Hdh * dm * 2 + K * dm * di * 2 + K * di * dm * 2
            + di * 4 + 5 * dm * 4 + B * T_pad * dm * 4)
    return pl.pallas_call(
        kernel,
        out_shape=jax.ShapeDtypeStruct((B, T_pad, dm), out_dtype),
        grid_spec=pltpu.PrefetchScalarGridSpec(
            num_scalar_prefetch=0,
            grid=(B, nT),
            in_specs=[
                pl.BlockSpec((1, 1, tTh, Hdh), lambda b, t: (b, t, 0, 0)),   # attn heads (halo)
                pl.BlockSpec((1, 1, tTh, dm), lambda b, t: (b, t, 0, 0)),    # residual x (halo)
                pl.BlockSpec((1, 1, tTh, 1), lambda b, t: (b, t, 0, 0)),     # seq mask (halo)
                pl.BlockSpec((Hdh, dm), lambda b, t: (0, 0), **const),       # wo   (bf16)
                pl.BlockSpec((K, dm, di), lambda b, t: (0, 0, 0), **const),  # w1   (bf16)
                pl.BlockSpec((1, di), lambda b, t: (0, 0), **const),         # b1
                pl.BlockSpec((K, di, dm), lambda b, t: (0, 0, 0), **const),  # w2   (bf16)
                pl.BlockSpec((1, dm), lambda b, t: (0, 0), **const),         # b2
                pl.BlockSpec((1, dm), lambda b, t: (0, 0), **const),         # ln_attn gamma
                pl.BlockSpec((1, dm), lambda b, t: (0, 0), **const),         # ln_attn beta
                pl.BlockSpec((1, dm), lambda b, t: (0, 0), **const),         # ln_ff gamma
                pl.BlockSpec((1, dm), lambda b, t: (0, 0), **const),         # ln_ff beta
            ],
            out_specs=pl.BlockSpec((1, tT, dm), lambda b, t: (b, t, 0)),
        ),
        compiler_params=pltpu.CompilerParams(
            dimension_semantics=("parallel", "parallel"),
            vmem_limit_bytes=48 * 1024 * 1024),
        cost_estimate=pl.CostEstimate(
            flops=int(flops),
            transcendentals=int(2 * B * T_pad),
            bytes_accessed=int(byts)),
    )


# ---------------------------------------------------------------------------
# Wrapper: full TransformerLayer forward (post-norm, eval mode).
# ---------------------------------------------------------------------------
def transformer_layer(x, mask, params, *, kernel_size, t_tile_max=256):
    """x: (B, T, d_model) f32; mask: (B, T, 1) float 1/0 (1 = valid frame).

    Weight layout (JAX-native): wq/wk/wv (H, d_model, d_head), bq/bk/bv
    (H, 1, d_head), wo (H*d_head, d_model), w1 (K, d_model, d_inner),
    w2 (K, d_inner, d_model)  (= torch Conv1d weight transposed (2, 1, 0)).
    """
    B, T, dm = x.shape
    H, _, dh = params["wq"].shape
    di = params["w1"].shape[2]
    K = kernel_size
    p = K // 2
    assert K % 2 == 1, "odd kernel_size required for 'same' Conv1d equivalence"

    # Sequence tiling: multiple-of-8 rows, bounded VMEM for long sequences.
    tT = _round_up(T, 8) if T <= t_tile_max else t_tile_max
    T_pad = _round_up(T, tT)
    nT = T_pad // tT
    tTh = tT + 4 * p                       # tile rows + (conv1 + conv2) halo

    x_p = jnp.pad(x, ((0, 0), (0, T_pad - T), (0, 0)))
    mask_p = jnp.pad(mask.astype(jnp.float32), ((0, 0), (0, T_pad - T), (0, 0)))

    # bf16 weights for the MXU; biases / LayerNorm params stay f32.
    wq = params["wq"].astype(jnp.bfloat16)
    wk = params["wk"].astype(jnp.bfloat16)
    wv = params["wv"].astype(jnp.bfloat16)
    wo = params["wo"].astype(jnp.bfloat16)
    w1 = params["w1"].astype(jnp.bfloat16)
    w2 = params["w2"].astype(jnp.bfloat16)

    # --- kernel 1: per-(batch, head) attention ------------------------------
    # The reference module flattens scores batch-major (permute(0,2,1,3)) but
    # tiles the key mask head-major (repeat(n_head, T, 1)), i.e. flat index
    # i = b*H + h uses the mask of batch (i % B).  Reproduce that exactly.
    sel = jnp.arange(B * H, dtype=jnp.int32) % B
    mask_sel = mask_p[:, :, 0][sel].reshape(B, H, 1, T_pad)
    heads = _attn_call(B, H, T_pad, dm, dh, jnp.bfloat16)(
        x_p.astype(jnp.bfloat16), mask_sel, wq, wk, wv,
        params["bq"], params["bk"], params["bv"])             # (B, H, T_pad, dh)

    # Reference re-assembly: attn_vec.view(n_head, B, T, dh).permute(1,2,0,3)
    # (the batch-major flat index is re-read head-major).  Pure layout
    # plumbing, so it lives in the wrapper, not the kernel.
    asm = heads.reshape(H, B, T_pad, dh).transpose(1, 2, 0, 3)
    asm = asm.reshape(B, T_pad, H * dh)

    # --- halo tiles for the fused o_net + LayerNorm + Conv-FF kernel --------
    def halo_tiles(a):                     # (B, T_pad, C) -> (B, nT, tT+4p, C)
        a_ext = jnp.pad(a, ((0, 0), (2 * p, 2 * p), (0, 0)))
        return jnp.stack(
            [a_ext[:, t * tT:t * tT + tTh] for t in range(nT)], axis=1)

    asm_h = halo_tiles(asm)                                    # bf16
    x_h = halo_tiles(x_p)                                      # f32 (residual)
    m_h = halo_tiles(mask_p)                                   # f32

    def run_ffn(single_buffer):
        return _ffn_call(single_buffer, B=B, nT=nT, tT=tT, tTh=tTh, dm=dm,
                         di=di, Hdh=H * dh, K=K, T_pad=T_pad, seq_len=T,
                         out_dtype=x.dtype)(
            asm_h, x_h, m_h, wo, w1, params["b1"], w2, params["b2"],
            params["ln_attn_g"], params["ln_attn_b"],
            params["ln_ff_g"], params["ln_ff_b"])

    try:
        out = run_ffn(True)      # single-buffer the grid-invariant weights
    except Exception:            # pragma: no cover
        # Fallback for Pallas builds without BlockSpec pipeline_mode support:
        # default double buffering (bf16 weights already halve the footprint).
        out = run_ffn(False)
    return out[:, :T, :]


# ---------------------------------------------------------------------------
# Pure-JAX reference: direct transcription of the PyTorch forward (eval mode).
# ---------------------------------------------------------------------------
def ref_transformer_layer(x, mask, params, *, kernel_size, eps=1e-5):
    B, T, dm = x.shape
    wq, wk, wv = params["wq"], params["wk"], params["wv"]
    bq, bk, bv = params["bq"], params["bk"], params["bv"]
    H, _, dh = wq.shape
    scale = 1.0 / (dh ** 0.5)
    pad = kernel_size // 2

    def ln(v, g, b):
        m = jnp.mean(v, axis=-1, keepdims=True)
        var = jnp.mean((v - m) ** 2, axis=-1, keepdims=True)
        return (v - m) / jnp.sqrt(var + eps) * g + b

    # ----- MultiHeadAttn (post-norm), mirroring the torch code --------------
    attn_mask = ~(mask[:, :, 0] > 0)                      # ~mask.squeeze(2)
    q = jnp.einsum("btc,hcd->bhtd", x, wq) + bq[None]     # chunk+view+permute(0,2,1,3)
    k = jnp.einsum("btc,hcd->bhtd", x, wk) + bk[None]
    v = jnp.einsum("btc,hcd->bhtd", x, wv) + bv[None]
    qf, kf, vf = (a.reshape(B * H, T, dh) for a in (q, k, v))
    score = jnp.einsum("itd,isd->its", qf, kf) * scale    # bmm(q, k^T) * scale
    rep = jnp.tile(attn_mask[:, None, :], (H, T, 1))      # unsqueeze(1).repeat(H,T,1)
    score = jnp.where(rep, -jnp.inf, score)               # masked_fill_(-inf)
    prob = jax.nn.softmax(score, axis=2)                  # dropatt = identity
    attn_vec = jnp.einsum("its,isd->itd", prob, vf)       # bmm(prob, v)
    # view(n_head, B, T, dh).permute(1, 2, 0, 3).reshape(B, T, n_head * dh)
    attn_vec = attn_vec.reshape(H, B, T, dh).transpose(1, 2, 0, 3)
    attn_vec = attn_vec.reshape(B, T, H * dh)
    attn_out = attn_vec @ params["wo"]                    # o_net (bias=False)
    out = ln(x + attn_out, params["ln_attn_g"], params["ln_attn_b"])
    out = out * mask                                      # output *= mask

    # ----- PositionwiseConvFF (post-norm) ------------------------------------
    def conv1d_same(v, w, b):                             # v (B,T,Cin), w (K,Cin,Cout)
        y = lax.conv_general_dilated(v, w, window_strides=(1,),
                                     padding=[(pad, pad)],
                                     dimension_numbers=("NHC", "HIO", "NHC"))
        return y + b

    h = jax.nn.relu(conv1d_same(out, params["w1"], params["b1"]))
    core = conv1d_same(h, params["w2"], params["b2"])     # dropout = identity
    out2 = ln(out + core, params["ln_ff_g"], params["ln_ff_b"])
    out2 = out2 * mask                                    # output *= mask
    return out2


if __name__ == "__main__":
    # Small shapes consistent with the module.
    B, T = 2, 16
    d_model, n_head, d_head = 32, 2, 16
    d_inner, K = 64, 3

    key = jax.random.PRNGKey(0)
    ks = jax.random.split(key, 16)

    def rnd(k, shape, s=0.1):
        return s * jax.random.normal(k, shape, jnp.float32)

    # Weight layout note: wq[h] = qkv_net.weight[h*dh:(h+1)*dh, :].T etc.
    params = {
        "wq": rnd(ks[0], (n_head, d_model, d_head)),
        "wk": rnd(ks[1], (n_head, d_model, d_head)),
        "wv": rnd(ks[2], (n_head, d_model, d_head)),
        "bq": rnd(ks[3], (n_head, 1, d_head)),
        "bk": rnd(ks[4], (n_head, 1, d_head)),
        "bv": rnd(ks[5], (n_head, 1, d_head)),
        "wo": rnd(ks[6], (n_head * d_head, d_model)),
        "ln_attn_g": 1.0 + rnd(ks[7], (1, d_model)),
        "ln_attn_b": rnd(ks[8], (1, d_model)),
        "w1": rnd(ks[9], (K, d_model, d_inner)),
        "b1": rnd(ks[10], (1, d_inner)),
        "w2": rnd(ks[11], (K, d_inner, d_model)),
        "b2": rnd(ks[12], (1, d_model)),
        "ln_ff_g": 1.0 + rnd(ks[13], (1, d_model)),
        "ln_ff_b": rnd(ks[14], (1, d_model)),
    }
    # Round matmul weights to bf16-representable values so the bf16 MXU path
    # and the f32 reference share identical weights.
    for name in ("wq", "wk", "wv", "wo", "w1", "w2"):
        params[name] = params[name].astype(jnp.bfloat16).astype(jnp.float32)

    x = jax.random.normal(ks[15], (B, T, d_model), jnp.float32)
    lengths = jnp.array([T, T - 4], jnp.int32)            # second batch has padding
    mask = (jnp.arange(T)[None, :] < lengths[:, None]).astype(jnp.float32)[..., None]

    out = transformer_layer(x, mask, params, kernel_size=K)
    out = jax.block_until_ready(out)

    ref = ref_transformer_layer(x, mask, params, kernel_size=K)
    assert out.shape == (B, T, d_model) and out.dtype == x.dtype
    max_err = float(jnp.max(jnp.abs(out - ref)))
    # bf16 MXU matmuls (f32 accumulation) -> looser tolerance than pure f32.
    assert jnp.allclose(out, ref, rtol=2e-2, atol=2e-2), max_err
    print("KERNEL_OK")
</pallas_src>

<mosaic_0001>
module attributes {stable_mosaic.version = 11 : i64} {
  func.func @_attn_head_kernel(%arg0: i32, %arg1: i32, %arg2: memref<1x16x32xbf16, #tpu.memory_space<vmem>>, %arg3: memref<1x1x1x16xf32, #tpu.memory_space<vmem>>, %arg4: memref<1x32x16xbf16, #tpu.memory_space<vmem>>, %arg5: memref<1x32x16xbf16, #tpu.memory_space<vmem>>, %arg6: memref<1x32x16xbf16, #tpu.memory_space<vmem>>, %arg7: memref<1x1x16xf32, #tpu.memory_space<vmem>>, %arg8: memref<1x1x16xf32, #tpu.memory_space<vmem>>, %arg9: memref<1x1x16xf32, #tpu.memory_space<vmem>>, %arg10: memref<1x1x16x16xbf16, #tpu.memory_space<vmem>>) attributes {dimension_semantics = [#tpu.dimension_semantics<parallel>, #tpu.dimension_semantics<parallel>], iteration_bounds = array<i64: 2, 2>, scalar_prefetch = 0 : i64, scratch_operands = 0 : i64, tpu.core_type = #tpu.core_type<tc>, window_params = [{transform_indices = @transform_0, window_bounds = array<i64: 1, 16, 32>}, {transform_indices = @transform_1, window_bounds = array<i64: 1, 1, 1, 16>}, {transform_indices = @transform_2, window_bounds = array<i64: 1, 32, 16>}, {transform_indices = @transform_3, window_bounds = array<i64: 1, 32, 16>}, {transform_indices = @transform_4, window_bounds = array<i64: 1, 32, 16>}, {transform_indices = @transform_5, window_bounds = array<i64: 1, 1, 16>}, {transform_indices = @transform_6, window_bounds = array<i64: 1, 1, 16>}, {transform_indices = @transform_7, window_bounds = array<i64: 1, 1, 16>}, {transform_indices = @transform_8, window_bounds = array<i64: 1, 1, 16, 16>}]} {
    %c0 = arith.constant 0 : index
    %c0_0 = arith.constant 0 : index
    %c0_1 = arith.constant 0 : index
    %0 = vector.load %arg2[%c0, %c0_0, %c0_1] : memref<1x16x32xbf16, #tpu.memory_space<vmem>>, vector<1x16x32xbf16>
    %1 = vector.shape_cast %0 : vector<1x16x32xbf16> to vector<16x32xbf16>
    %c0_2 = arith.constant 0 : index
    %c0_3 = arith.constant 0 : index
    %c0_4 = arith.constant 0 : index
    %2 = vector.load %arg4[%c0_2, %c0_3, %c0_4] : memref<1x32x16xbf16, #tpu.memory_space<vmem>>, vector<1x32x16xbf16>
    %3 = vector.shape_cast %2 : vector<1x32x16xbf16> to vector<32x16xbf16>
    %cst = arith.constant dense<0.000000e+00> : vector<16x16xf32>
    %4 = tpu.matmul %1, %3, %cst {dimension_numbers = #tpu.dot_dimension_numbers<[1], [0], [0], [1], [0, 0, 1, 1], [], []>} : vector<16x32xbf16>, vector<32x16xbf16>, vector<16x16xf32> -> vector<16x16xf32>
    %c0_5 = arith.constant 0 : index
    %c0_6 = arith.constant 0 : index
    %c0_7 = arith.constant 0 : index
    %5 = vector.load %arg7[%c0_5, %c0_6, %c0_7] : memref<1x1x16xf32, #tpu.memory_space<vmem>>, vector<1x1x16xf32>
    %6 = vector.shape_cast %5 : vector<1x1x16xf32> to vector<1x16xf32>
    %7 = vector.broadcast %6 : vector<1x16xf32> to vector<16x16xf32>
    %8 = arith.addf %4, %7 : vector<16x16xf32>
    %c0_8 = arith.constant 0 : index
    %c0_9 = arith.constant 0 : index
    %c0_10 = arith.constant 0 : index
    %9 = vector.load %arg5[%c0_8, %c0_9, %c0_10] : memref<1x32x16xbf16, #tpu.memory_space<vmem>>, vector<1x32x16xbf16>
    %10 = vector.shape_cast %9 : vector<1x32x16xbf16> to vector<32x16xbf16>
    %cst_11 = arith.constant dense<0.000000e+00> : vector<16x16xf32>
    %11 = tpu.matmul %1, %10, %cst_11 {dimension_numbers = #tpu.dot_dimension_numbers<[1], [0], [0], [1], [0, 0, 1, 1], [], []>} : vector<16x32xbf16>, vector<32x16xbf16>, vector<16x16xf32> -> vector<16x16xf32>
    %c0_12 = arith.constant 0 : index
    %c0_13 = arith.constant 0 : index
    %c0_14 = arith.constant 0 : index
    %12 = vector.load %arg8[%c0_12, %c0_13, %c0_14] : memref<1x1x16xf32, #tpu.memory_space<vmem>>, vector<1x1x16xf32>
    %13 = vector.shape_cast %12 : vector<1x1x16xf32> to vector<1x16xf32>
    %14 = vector.broadcast %13 : vector<1x16xf32> to vector<16x16xf32>
    %15 = arith.addf %11, %14 : vector<16x16xf32>
    %c0_15 = arith.constant 0 : index
    %c0_16 = arith.constant 0 : index
    %c0_17 = arith.constant 0 : index
    %16 = vector.load %arg6[%c0_15, %c0_16, %c0_17] : memref<1x32x16xbf16, #tpu.memory_space<vmem>>, vector<1x32x16xbf16>
    %17 = vector.shape_cast %16 : vector<1x32x16xbf16> to vector<32x16xbf16>
    %cst_18 = arith.constant dense<0.000000e+00> : vector<16x16xf32>
    %18 = tpu.matmul %1, %17, %cst_18 {dimension_numbers = #tpu.dot_dimension_numbers<[1], [0], [0], [1], [0, 0, 1, 1], [], []>} : vector<16x32xbf16>, vector<32x16xbf16>, vector<16x16xf32> -> vector<16x16xf32>
    %c0_19 = arith.constant 0 : index
    %c0_20 = arith.constant 0 : index
    %c0_21 = arith.constant 0 : index
    %19 = vector.load %arg9[%c0_19, %c0_20, %c0_21] : memref<1x1x16xf32, #tpu.memory_space<vmem>>, vector<1x1x16xf32>
    %20 = vector.shape_cast %19 : vector<1x1x16xf32> to vector<1x16xf32>
    %21 = vector.broadcast %20 : vector<1x16xf32> to vector<16x16xf32>
    %22 = arith.addf %18, %21 : vector<16x16xf32>
    %23 = arith.truncf %8 : vector<16x16xf32> to vector<16x16xbf16>
    %24 = arith.truncf %15 : vector<16x16xf32> to vector<16x16xbf16>
    %cst_22 = arith.constant dense<0.000000e+00> : vector<16x16xf32>
    %25 = tpu.matmul %23, %24, %cst_22 {dimension_numbers = #tpu.dot_dimension_numbers<[1], [1], [0], [0], [0, 0, 1, 0], [], []>} : vector<16x16xbf16>, vector<16x16xbf16>, vector<16x16xf32> -> vector<16x16xf32>
    %cst_23 = arith.constant 2.500000e-01 : f32
    %26 = vector.broadcast %cst_23 : f32 to vector<16x16xf32>
    %27 = arith.mulf %25, %26 : vector<16x16xf32>
    %c0_24 = arith.constant 0 : index
    %c0_25 = arith.constant 0 : index
    %c0_26 = arith.constant 0 : index
    %c0_27 = arith.constant 0 : index
    %28 = vector.load %arg3[%c0_24, %c0_25, %c0_26, %c0_27] : memref<1x1x1x16xf32, #tpu.memory_space<vmem>>, vector<1x1x1x16xf32>
    %29 = vector.shape_cast %28 : vector<1x1x1x16xf32> to vector<1x16xf32>
    %cst_28 = arith.constant 0.000000e+00 : f32
    %30 = vector.broadcast %cst_28 : f32 to vector<1x16xf32>
    %31 = arith.cmpf ogt, %29, %30 : vector<1x16xf32>
    %cst_29 = arith.constant 0xFF800000 : f32
    %32 = vector.shape_cast %31 : vector<1x16xi1> to vector<1x16xi1>
    %33 = vector.broadcast %32 : vector<1x16xi1> to vector<16x16xi1>
    %34 = vector.broadcast %cst_29 : f32 to vector<16x16xf32>
    %35 = arith.select %33, %27, %34 : vector<16x16xi1>, vector<16x16xf32>
    %cst_30 = arith.constant dense<0xFF800000> : vector<16xf32>
    %36 = vector.multi_reduction <maximumf>, %35, %cst_30 [1] : vector<16x16xf32> to vector<16xf32>
    %37 = vector.shape_cast %36 : vector<16xf32> to vector<16x1xf32>
    %38 = vector.broadcast %37 : vector<16x1xf32> to vector<16x16xf32>
    %39 = arith.subf %35, %38 : vector<16x16xf32>
    %40 = math.exp %39 : vector<16x16xf32>
    %cst_31 = arith.constant dense<0.000000e+00> : vector<16xf32>
    %41 = vector.multi_reduction <add>, %40, %cst_31 [1] : vector<16x16xf32> to vector<16xf32>
    %42 = vector.shape_cast %41 : vector<16xf32> to vector<16x1xf32>
    %43 = tpu.reciprocal %42 {approx = true} : vector<16x1xf32> -> vector<16x1xf32>
    %44 = vector.broadcast %43 : vector<16x1xf32> to vector<16x16xf32>
    %45 = arith.mulf %40, %44 : vector<16x16xf32>
    %46 = arith.truncf %45 : vector<16x16xf32> to vector<16x16xbf16>
    %47 = arith.truncf %22 : vector<16x16xf32> to vector<16x16xbf16>
    %cst_32 = arith.constant dense<0.000000e+00> : vector<16x16xf32>
    %48 = tpu.matmul %46, %47, %cst_32 {dimension_numbers = #tpu.dot_dimension_numbers<[1], [0], [0], [1], [0, 0, 1, 1], [], []>} : vector<16x16xbf16>, vector<16x16xbf16>, vector<16x16xf32> -> vector<16x16xf32>
    %49 = arith.truncf %48 : vector<16x16xf32> to vector<16x16xbf16>
    %c0_33 = arith.constant 0 : index
    %c0_34 = arith.constant 0 : index
    %c0_35 = arith.constant 0 : index
    %c0_36 = arith.constant 0 : index
    %50 = vector.load %arg10[%c0_33, %c0_34, %c0_35, %c0_36] : memref<1x1x16x16xbf16, #tpu.memory_space<vmem>>, vector<1x1x16x16xbf16>
    %51 = vector.shape_cast %50 : vector<1x1x16x16xbf16> to vector<16x16xbf16>
    %52 = vector.shape_cast %49 : vector<16x16xbf16> to vector<1x1x16x16xbf16>
    tpu.vector_store %arg10[%c0_33, %c0_34, %c0_35, %c0_36], %52 {strides = array<i32>} : memref<1x1x16x16xbf16, #tpu.memory_space<vmem>>, vector<1x1x16x16xbf16>,
    return
  }
  func.func @transform_0(%arg0: i32, %arg1: i32) -> (i32, i32, i32) {
    %c0_i32 = arith.constant 0 : i32
    %c0_i32_0 = arith.constant 0 : i32
    %c0_i32_1 = arith.constant 0 : i32
    return %arg0, %c0_i32, %c0_i32_0 : i32, i32, i32
  }
  func.func @transform_1(%arg0: i32, %arg1: i32) -> (i32, i32, i32, i32) {
    %c0_i32 = arith.constant 0 : i32
    %c0_i32_0 = arith.constant 0 : i32
    %c0_i32_1 = arith.constant 0 : i32
    return %arg0, %arg1, %c0_i32, %c0_i32_0 : i32, i32, i32, i32
  }
  func.func @transform_2(%arg0: i32, %arg1: i32) -> (i32, i32, i32) {
    %c0_i32 = arith.constant 0 : i32
    %c0_i32_0 = arith.constant 0 : i32
    %c0_i32_1 = arith.constant 0 : i32
    return %arg1, %c0_i32, %c0_i32_0 : i32, i32, i32
  }
  func.func @transform_3(%arg0: i32, %arg1: i32) -> (i32, i32, i32) {
    %c0_i32 = arith.constant 0 : i32
    %c0_i32_0 = arith.constant 0 : i32
    %c0_i32_1 = arith.constant 0 : i32
    return %arg1, %c0_i32, %c0_i32_0 : i32, i32, i32
  }
  func.func @transform_4(%arg0: i32, %arg1: i32) -> (i32, i32, i32) {
    %c0_i32 = arith.constant 0 : i32
    %c0_i32_0 = arith.constant 0 : i32
    %c0_i32_1 = arith.constant 0 : i32
    return %arg1, %c0_i32, %c0_i32_0 : i32, i32, i32
  }
  func.func @transform_5(%arg0: i32, %arg1: i32) -> (i32, i32, i32) {
    %c0_i32 = arith.constant 0 : i32
    %c0_i32_0 = arith.constant 0 : i32
    %c0_i32_1 = arith.constant 0 : i32
    return %arg1, %c0_i32, %c0_i32_0 : i32, i32, i32
  }
  func.func @transform_6(%arg0: i32, %arg1: i32) -> (i32, i32, i32) {
    %c0_i32 = arith.constant 0 : i32
    %c0_i32_0 = arith.constant 0 : i32
    %c0_i32_1 = arith.constant 0 : i32
    return %arg1, %c0_i32, %c0_i32_0 : i32, i32, i32
  }
  func.func @transform_7(%arg0: i32, %arg1: i32) -> (i32, i32, i32) {
    %c0_i32 = arith.constant 0 : i32
    %c0_i32_0 = arith.constant 0 : i32
    %c0_i32_1 = arith.constant 0 : i32
    return %arg1, %c0_i32, %c0_i32_0 : i32, i32, i32
  }
  func.func @transform_8(%arg0: i32, %arg1: i32) -> (i32, i32, i32, i32) {
    %c0_i32 = arith.constant 0 : i32
    %c0_i32_0 = arith.constant 0 : i32
    %c0_i32_1 = arith.constant 0 : i32
    return %arg0, %arg1, %c0_i32, %c0_i32_0 : i32, i32, i32, i32
  }
}

</mosaic_0001>

<bundles_post_ra>
// kernel: tpu_custom_call.1
= control target key start
LH: loop header
LB: loop body
LE: loop exit
PB: predicated region body
PF: predicated region fallthrough
CT: control target
= control target key end

     0   :  { %13 = vsyncpa [#allocation3], 0  ;;  %s1482_s0 = inlined_call_operand.vmem [shape: bf16[2,16,32], index: 0, kind: input, shape index: {}]   ;;  %s1483_s1 = inlined_call_operand.vmem [shape: f32[2,2,1,16], index: 1, kind: input, shape index: {}]   ;;  %s1484_s2 = inlined_call_operand.vmem [shape: bf16[2,32,16], index: 2, kind: input, shape index: {}]   ;;  %s1485_s3 = inlined_call_operand.vmem [shape: bf16[2,32,16], index: 3, kind: input, shape index: {}]   ;;  %s1486_s4 = inlined_call_operand.vmem [shape: bf16[2,32,16], index: 4, kind: input, shape index: {}]   ;;  %s1487_s5 = inlined_call_operand.vmem [shape: f32[2,1,16], index: 5, kind: input, shape index: {}]   ;;  %s1488_s6 = inlined_call_operand.vmem [shape: f32[2,1,16], index: 6, kind: input, shape index: {}]   ;;  %s1489_s7 = inlined_call_operand.vmem [shape: f32[2,1,16], index: 7, kind: input, shape index: {}]   ;;  %s1490_s8 = inlined_call_operand.hbm [shape: bf16[2,2,16,16], index: 8, kind: output, shape index: {}]  }
   0x1   :  { %15 = vsyncpa [#allocation3 + $0x1], 0  ;;  %s1292_s27 = smov 0   ;;  %s1294_s28 = smov 0  }
   0x2   :  { %s1296_s29 = smov 0   ;;  %s1298_s30 = smov 0  }
   0x3   :  { %s1300_s9 = smov 0   ;;  %s1302_s10 = smov 0  }
   0x4   :  { %s1304_s11 = smov 0   ;;  %s1306_s12 = smov 0  }
   0x5 LB: > { %1495 = sst [smem:[#allocation5_spill]] %s1231_s10  ;;  %s963_s13 = sadd.s32 4294967295, %s1239_s12   ;;  %s1239_s12 = sphi %s1306_s12, %s21_s12   ;;  %s1235_s11 = sphi %s1304_s11, %s1506_s11   ;;  %s1231_s10 = sphi %s1302_s10, %s1505_s10   ;;  %s1227_s9 = sphi %s1300_s9, %s1504_s9   ;;  %s1223_s30 = sphi %s1298_s30, %s1503_s30   ;;  %s1219_s29 = sphi %s1296_s29, %s1509_s29   ;;  %s1215_s28 = sphi %s1294_s28, %s1508_s28   ;;  %s1211_s27 = sphi %s1292_s27, %s1507_s27  }
   0x6   : > { %1496 = sst [smem:[#allocation6_spill]] %s1235_s11  ;;  %s964_s14 = sadd.s32 4294967294, %s1239_s12  }
   0x7   : > { %s30_s15 = sadd.s32 1, %s1231_s10  ;;  %s33_s16 = sadd.s32 1, %s1235_s11 }
   0x8   : > { %p31_p0 = scmp.ge.s32.totalorder %s30_s15, 2  ;;  %p262_p1 = scmp.ne.s32.totalorder %s1219_s29, %s1215_s28 }
   0x9   : > { %p263_p2 = scmp.eq.s32.totalorder %s963_s13, 3  ;;  %p268_p5 = scmp.ne.s32.totalorder %s1215_s28, %s1211_s27 }
   0xa   : > { %s1511_s15 = smov (%p31_p0, %s30_s15), 0  ;;  %s1513_s16 = smov (!%p31_p0, %s33_s16), %s1235_s11 }
   0xb   : > { %1497 = sst [smem:[#allocation7_spill]] %s1511_s15  ;;  %s248_s17 = ssub.s32 %s1231_s10, %s1511_s15 }
   0xc   : > { %p1343_p3 = por %p263_p2, %p262_p1  ;;  %p35_p4 = scmp.ge.s32.totalorder %s1513_s16, 2 }
   0xd   : > { %p269_p6 = scmp.eq.s32.totalorder %s964_s14, 3  ;;  %p967_p7 = scmp.ge.s32.totalorder %s1239_s12, 1 }
   0xe   : > { %s1515_s16 = smov (%p35_p4, %s1513_s16), 0  ;;  %p347_p9 = scmp.lt.s32.totalorder %s1239_s12, 5 }
   0xf   : > { %1499 = sst [smem:[#allocation8_spill]] %s1515_s16  ;;  %p1352_p8 = por %p269_p6, %p268_p5 }
  0x10   : > { %s247_s20 = ssub.s32 %s1235_s11, %s1515_s16  ;;  %s252_s21 = sadd.s32 1, %s1219_s29 }
  0x11   : > { %s249_s22 = sor.u32 %s248_s17, %s247_s20  ;;  %p348_p10 = pnand %p967_p7, %p347_p9 }
  0x12   : > { %p250_p11 = scmp.eq.s32.totalorder %s249_s22, 0  ;;  %p419_p12 = scmp.lt.s32.totalorder (!%p348_p10), %s1223_s30, 1 }
  0x13   : > { %351 = sbr.rel (%p348_p10) target bundleno = 972 (0x3cc), region = 52  ;;  %p412_p13 = scmp.lt.s32.totalorder (!%p348_p10), %s1227_s9, 1 }
  0x14   : > { %s1361_s23 = scalar_select %p250_p11, %s1219_s29, %s252_s21  }
  0x15   : > { %s996_s15 = sshll.u32 (!%p348_p10), %s1223_s30, 1 }
  0x16   : > { %1501 = sst [smem:[#allocation9_spill]] %s1361_s23 }
  0x18   : > { %v1241_v0 = vmov 0.0   ;;  %s1366_s24 = scalar_select %p419_p12, %s1223_s30, 1  ;;  %vm1242_vm0 = vmmov 0   ;;  %vm479_vm1 = vcmask 261120   ;;  %vm654_vm2 = vcmask 130048  }
  0x19   : > { %1028 = vmatprep.subr.bf16.mxu1 %v1241_v0  ;;  %1020 = vmatprep.subr.bf16.mxu0 %v1241_v0  ;;  %s1371_s25 = scalar_select %p412_p13, %s1227_s9, 1  ;;  %v707_v25 = vlaneseq  ;;  %v1243_v29 = vmov 0   ;;  %vm790_vm5 = vcmask 125952  }
  0x1a   : > { %1032 = vmatprep.mubr.msk.bf16.mxu1 %vm1242_vm0, %v1241_v0  ;;  %1024 = vmatprep.mubr.msk.bf16.mxu0 %vm1242_vm0, %v1241_v0  ;;  %s1002_s26 = sshll.u32 %s1366_s24, 4  ;;  %s447_s11 = scalar_lea.vmem %s1489_s7, %s1366_s24 }
  0x1b   : > { %s433_s17 = scalar_lea.vmem %s1485_s3, %s1002_s26  ;;  %s428_s22 = scalar_lea.vmem %s1484_s2, %s1002_s26  ;;  %v708_v27 = vshrl.u32 %v707_v25, 7  ;;  %v987_v54 = vld [vmem:[%s447_s11] ss:$0 sm:$0xff] }
  0x1c   : > { %v1132_v1 = vld [vmem:[%s433_s17 + $0x8] sm:$0xff]   ;;  %s1001_s16 = sshll.u32 %s1371_s25, 3  ;;  %v1134_v3 = vld [vmem:[%s433_s17] sm:$0xff]   ;;  %s1387_s14 = scalar_lea.vmem %s1486_s4, %s1002_s26 }
  0x1d   : > { %v1133_v2 = vld [vmem:[%s428_s22 + $0x8] sm:$0xff]   ;;  %s416_s10 = scalar_lea.vmem %s1482_s0, %s1001_s16  ;;  %1029 = vmatpush3.bf16.msra.mxu1 %v1132_v1  ;;  %v1135_v4 = vld [vmem:[%s428_s22] sm:$0xff]   ;;  %s444_s16 = scalar_lea.vmem %s1488_s6, %s1366_s24  ;;  %v709_v28 = vsub.s32 0, %v708_v27 }
  0x1e   : > { %1021 = vmatpush3.bf16.msra.mxu0 %v1133_v2  ;;  %1030 = vmatprep.subr.bf16.mxu1 %v1241_v0  ;;  %v1136_v5 = vld [vmem:[%s416_s10] sm:$0xff]   ;;  %s441_s26 = scalar_lea.vmem %s1487_s5, %s1366_s24  ;;  %v1137_v23 = vld [vmem:[%s1387_s14 + $0x8] sm:$0xff]   ;;  %s971_s17 = sshll.u32 %s1371_s25, 1 }
  0x1f   : > { %1022 = vmatprep.subr.bf16.mxu0 %v1241_v0  ;;  %v983_v8 = vld [vmem:[%s444_s16] ss:$0 sm:$0xff]  ;;  %s422_s20 = sadd.s32 %s971_s17, %s1366_s24  ;;  %s409_s24 = sand.u32 1, %s1215_s28  }
  0x20   : > { %v978_v18 = vld [vmem:[%s441_s26] ss:$0 sm:$0xff]  ;;  %s423_s13 = scalar_lea.vmem %s1483_s1, %s422_s20  ;;  %s997_s16 = sshll.u32 %s1227_s9, 2 }
  0x21   : > { %1031 = vmatpush3.bf16.msra.mxu1 %v1134_v3  ;;  %v1138_v24 = vld [vmem:[%s1387_s14] sm:$0xff]   ;;  %s968_s10 = sshll.u32 %s409_s24, 3  ;;  %s806_s23 = sadd.s32 %s997_s16, %s996_s15 }
  0x22   : > { %1023 = vmatpush3.bf16.msra.mxu0 %v1135_v4  ;;  %1044 = vmatprep.subr.bf16.mxu1 %v1241_v0  ;;  %v704_v26 = vld [vmem:[%s423_s13] sm:$0x1]  ;;  %s411_s26 = scalar_lea.vmem [#allocation2], %s968_s10  ;;  %s998_s20 = sshll.u32 %s806_s23, 6 }
  0x23   : > { %1036 = vmatprep.subr.bf16.mxu0 %v1241_v0  ;;  %vm705_vm3 = vcmp.gt.f32.partialorder %v704_v26, 0.0  ;;  %s809_s17 = sshll.u32 %s411_s26, 4  ;;  %s1429_s21 = scalar_lea.hbm %s1490_s8, %s998_s20  ;;  %s1424_s17 = int_to_ptr.vmem [resolvable:$true] %s809_s17 }
  0x24   : > { %1033 = vmatmul.mubr.msk.bf16.vlgmr.msra.gmra.mxu1 %vm479_vm1, %v1136_v5  ;;  %v706_v30 = vsel %vm705_vm3, 1, %v1243_v29  ;;  %s1431_s22 = scalar_lea.sflag [#allocation3], %s409_s24  ;;  %s1147_s13 = scalar_lea.vmem %s1424_s17, 128 }
  0x25   : > { %1025 = vmatmul.mubr.msk.bf16.vlgmr.msra.gmra.mxu0 %vm479_vm1, %v1136_v5  ;;  %1046 = vmatprep.mubr.msk.bf16.mxu1 %vm1242_vm0, %v1241_v0  ;;  %v710_v31 = vrot.slane %v706_v30, %v709_v28  ;;  %p1148_p0 = scmp.ne.s32.totalorder %s1424_s17, %s1147_s13  ;;  %s1244_s25 = smov [#allocation2]  }
  0x26   : > { %1040 = vmatprep.mubr.msk.bf16.mxu0 %vm1242_vm0, %v1241_v0  ;;  %1037 = vmatpush3.bf16.msra.mxu0 %v1137_v23  ;;  %s1151_s14 = sshll.u32 %s1244_s25, 4  ;;  %s1152_s14 = int_to_ptr.vmem [resolvable:$false] %s1151_s14 }
  0x27   : > { %1038 = vmatprep.subr.bf16.mxu0 %v1241_v0  ;;  %vm711_vm4 = vcmp.eq.s32.totalorder %v710_v31, 1  ;;  %p1149_p1 = pnand %p1148_p0, %p1343_p3  ;;  %s1153_s11 = scalar_lea.vmem %s1152_s14, 256 }
  0x28   : > { %p1154_p4 = scmp.lt.s32.totalorder %s1424_s17, %s1152_s14  ;;  %p1155_p5 = scmp.lt.s32.totalorder %s1153_s11, %s1147_s13 }
  0x29   : > { %p1150_p2 = pneg %p1149_p1 }
  0x2a   : > { %1039 = vmatpush3.bf16.msra.mxu0 %v1138_v24  ;;  %p1156_p6 = por %p1155_p5, %p1154_p4 }
  0x2b   : > { %1050 = vmatprep.subr.bf16.mxu0 %v1241_v0 }
  0x2c   : > { %p1157_p7 = pnand %p1156_p6, %p1150_p2 }
  0x2d   : > { %1041 = vmatmul.mubr.msk.bf16.vlgmr.msra.gmra.mxu0 %vm479_vm1, %v1136_v5 }
  0x2e   : > { %1052 = vmatprep.mubr.msk.bf16.mxu0 %vm1242_vm0, %v1241_v0 }
  0xe4   : > { %v581_v6 = vpop.f32.mrf.mxu1 }
  0xe5   : > { %v517_v7 = vpop.f32.mrf.mxu0  ;;  %v582_v12 = vadd.f32 %v983_v8, %v581_v6 }
  0xe6   : > { %v1034_v9 = vpop.f32.mrf.mxu1  ;;  %v518_v20 = vadd.f32 %v978_v18, %v517_v7 }
  0xe7   : > { %v1026_v10 = vpop.f32.mrf.mxu0 }
  0xe8   : > { %v584_v11 = vpop.f32.mrf.mxu1 }
  0xe9   : > { %v585_v13 = vadd.f32 %v983_v8, %v584_v11  ;;  %v520_v14 = vpop.f32.mrf.mxu0 }
  0xea   : > { %v1035_v15 = vpop.f32.mrf.mxu1  ;;  %v521_v21 = vadd.f32 %v978_v18, %v520_v14 }
  0xeb   : > { %v653_v16 = vpack.c.bf16 %v585_v13, %v582_v12  ;;  %v1027_v17 = vpop.f32.mrf.mxu0 }
  0xec   : > { %v652_v22 = vpack.c.bf16 %v521_v21, %v518_v20 }
  0xed   : > { %v659_v19 = vsel %vm654_vm2, %v653_v16, 0  ;;  %v645_v52 = vpop.f32.mrf.mxu0 }
  0xee   : > { %1045 = vmatpush3.bf16.xpose.msra.mxu1 %v659_v19  ;;  %v646_v56 = vadd.f32 %v987_v54, %v645_v52 }
  0xef   : > { %v1042_v53 = vpop.f32.mrf.mxu0 }
  0xf1   : > { %v648_v55 = vpop.f32.mrf.mxu0 }
  0xf2   : > { %v649_v58 = vadd.f32 %v987_v54, %v648_v55 }
  0xf3   : > { %v1043_v57 = vpop.f32.mrf.mxu0 }
  0xf4   : > { %v737_v59 = vpack.c.bf16 %v649_v58, %v646_v56 }
  0xf5   : > { %1047 = vmatmul.mubr.msk.bf16.vlgmr.msra.gmra.mxu1 %vm654_vm2, %v652_v22 }
  0xf6   : > { %1051 = vmatpush3.bf16.msra.mxu0 %v737_v59 }
 0x1b5   : > { %v695_v32 = vpop.f32.mrf.mxu1 }
 0x1b6   : > { %v702_v33 = vmul.f32 0.25, %v695_v32 }
 0x1b7   : > { %v1048_v34 = vpop.f32.mrf.mxu1 }
 0x1b8   : > { %v712_v35 = vsel %vm711_vm4, %v702_v33, -inf }
 0x1b9   : > { %v698_v36 = vpop.f32.mrf.mxu1  ;;  %v714_v37 = vsel %vm654_vm2, %v712_v35, -inf }
 0x1ba   : > { %v703_v38 = vmul.f32 0.25, %v698_v36  ;;  %715 = vmax.xlane.f32.xlu0 %v714_v37 }
 0x1bb   : > { %v1049_v39 = vpop.f32.mrf.mxu1 }
 0x1bc   : > { %v713_v40 = vsel %vm711_vm4, %v703_v38, -inf }
 0x1bd   : > { %v717_v41 = vsel %vm654_vm2, %v713_v40, -inf }
 0x1be   : > { %718 = vmax.xlane.f32.xlu0 %v717_v41 }
 0x243   : > { %v716_v42 = vpop.xlane.xlu0 %715 }
 0x244   : > { %v720_v43 = vsub.f32 %v712_v35, %v716_v42 }
 0x246   : > { %v722_v44 = vmul.f32 1.442695, %v720_v43 }
 0x247   : > { %v719_v45 = vpop.xlane.xlu0 %718 }
 0x248   : > { %1139 = vpow2.f32 %v722_v44  ;;  %v721_v46 = vsub.f32 %v713_v40, %v719_v45 }
 0x24a   : > { %v724_v47 = vmul.f32 1.442695, %v721_v46 }
 0x24c   : > { %1141 = vpow2.f32 %v724_v47 }
 0x255   : > { %v1140_v48 = vpop.eup %1139 }
 0x256   : > { %v726_v49 = vsel %vm654_vm2, %v1140_v48, 0.0 }
 0x257   : > { %727 = vadd.xlane.f32.xlu1 %v726_v49 }
 0x259   : > { %v1142_v50 = vpop.eup %1141 }
 0x25a   : > { %v729_v51 = vsel %vm654_vm2, %v1142_v50, 0.0 }
 0x25b   : > { %730 = vadd.xlane.f32.xlu1 %v729_v51 }
 0x2e0   : > { %v728_v60 = vpop.xlane.xlu1 %727 }
 0x2e1   : > { %1143 = vrcp.f32 %v728_v60 }
 0x2e4   : > { %v731_v61 = vpop.xlane.xlu1 %730 }
 0x2e5   : > { %1145 = vrcp.f32 %v731_v61 }
 0x2ee   : > { %v1144_v62 = vpop.eup %1143 }
 0x2ef   : > { %v734_v1 = vmul.f32 %v1144_v62, %v1140_v48 }
 0x2f2   : > { %v1146_v63 = vpop.eup %1145 }
 0x2f3   : > { %v735_v0 = vmul.f32 %v1146_v63, %v1142_v50 }
 0x2f5   : > { %v736_v2 = vpack.c.bf16 %v735_v0, %v734_v1 }
 0x2f7   : > { %1053 = vmatmul.mubr.msk.bf16.vlgmr.msra.gmra.mxu0 %vm654_vm2, %v736_v2 }
 0x3b7   : > { %v775_v3 = vpop.f32.mrf.mxu0 }
 0x3b8   : > { %v1005_v4 = vpack.c.bf16 %v775_v3, %v775_v3 }
 0x3b9   : > { %v1054_v5 = vpop.f32.mrf.mxu0 }
 0x3ba   : > { %791 = vst.msk [vmem:[%s411_s26] sm:$0xf] %vm790_vm5, %v1005_v4 }
 0x3bb   : > { %v778_v6 = vpop.f32.mrf.mxu0 }
 0x3bc   : > { %v1006_v7 = vpack.c.bf16 %v778_v6, %v778_v6 }
 0x3bd   : > { %v1055_v8 = vpop.f32.mrf.mxu0 }
 0x3be   : > { %792 = vst.msk [vmem:[%s411_s26 + $0x4] sm:$0xf] %vm790_vm5, %v1006_v7 }
 0x3bf   : > { %1160 = shalt.err (!%p1157_p7)
}
 0x3c0   : > { %s1161_s24 = scalar_lea.hbm %s1429_s21, 128  ;;  %s1165_s10 = scalar_lea.hbm %s1490_s8, 512 }
 0x3c1   : > { %p1162_p9 = scmp.ne.s32.totalorder %s1429_s21, %s1161_s24  ;;  %p1166_p12 = scmp.lt.s32.totalorder %s1429_s21, %s1490_s8 }
 0x3c2   : > { %p1167_p13 = scmp.lt.s32.totalorder %s1165_s10, %s1161_s24 }
 0x3c3   : > { %p1163_p10 = pnand %p1162_p9, %p1343_p3 }
 0x3c4   : > { %p1168_p0 = por %p1167_p13, %p1166_p12 }
 0x3c5   : > { %p1164_p11 = pneg %p1163_p10 }
 0x3c7   : > { %p1169_p1 = pnand %p1168_p0, %p1164_p11 }
 0x3c9   : > { %1172 = shalt.err (!%p1169_p1)
}
 0x3ca   : > { %s1245_s20 = smov 64   ;;  %s1246_s30 = smov 4  }
 0x3cb   : > { %1056 = dma.vmem_to_hbm [thread:$0]  (%p1343_p3), %s1424_s17, 128, %s1429_s21, %s1431_s22, %s1245_s20, %s1245_s20, %s1246_s30  }
 0x3cc PF: > { %p1062_p2 = scmp.ge.s32.totalorder %s1239_s12, 2  ;;  %s824_s9 = sand.u32 1, %s1211_s27  }
 0x3cd   : > { %s825_s13 = scalar_lea.sflag [#allocation3], %s824_s9 }
 0x3ce   : > { %p1059_p4 = pnand %p1062_p2, %p1352_p8 }
 0x3d0   : > { %p1060_p5 = pneg %p1059_p4 }
 0x3d2   : > { %1206 = dma.done.wait (%p1060_p5), %s825_s13, 128  }
 0x3d3   : > { %1208 = vsyncadd (%p1060_p5), %s825_s13, 4294967168  ;;  %s21_s12 = sadd.s32 1, %s1239_s12   ;;  %s1502_s25 = sld [smem:[#allocation9_spill]] }
 0x3d4   : > { %p18_p6 = scmp.ge.s32.totalorder %s21_s12, 6   ;;  %s1503_s30 = sld [smem:[#allocation5_spill]] }
 0x3d5   : > { %s1504_s9 = sld [smem:[#allocation6_spill]]  ;;  %s1507_s27 = smov %s1215_s28 }
 0x3d6   : > { %s1505_s10 = sld [smem:[#allocation7_spill]]  ;;  %s1508_s28 = smov %s1219_s29 }
 0x3d7   : > { %s1506_s11 = sld [smem:[#allocation8_spill]]  ;;  %20 = sbr.rel (!%p18_p6) target bundleno = 5 (0x5), region = 108 }
 0x3d9   : > { %s1509_s29 = smov %s1502_s25 }
 0x3dc   :  { %830 = vsyncpa [#allocation3], 1 }
 0x3dd   :  { %832 = vsyncpa [#allocation3 + $0x1], 1 }

</bundles_post_ra>
